<compile_context>
chip_gen: v5e
topology: v5e:2x2
jax: 0.10.0
libtpu: 0.0.40
codegen_flags: <defaults>
</compile_context>

<pallas_src>
import jax
import jax.numpy as jnp
from jax import lax
from jax.experimental import pallas as pl
from jax.experimental.pallas import tpu as pltpu

_LANE = 128
_SUBLANE = 8


def _round_up(x, m):
    return ((x + m - 1) // m) * m


def _make_bce_kernel(tm, tail_valid, needs_mask):
    """Kernel closure over static tile height / last-tile valid-element count."""

    def kernel(logits_ref, targets_ref, loss_m_ref, partial_ref):
        x = logits_ref[...].astype(jnp.float32)
        t = targets_ref[...].astype(jnp.float32)

        # Numerically-stable BCE-with-logits (torch formulation):
        #   max(x, 0) - x * t + log(1 + exp(-|x|))
        lm = jnp.maximum(x, 0.0) - x * t + jnp.log1p(jnp.exp(-jnp.abs(x)))
        loss_m_ref[...] = lm.astype(loss_m_ref.dtype)

        # Hot path: unmasked per-lane partial sum (sublane-axis reduction only;
        # the 128-lane reduction is finished in the wrapper).
        partial_ref[...] = jnp.sum(lm, axis=0, keepdims=True)[None]

        if needs_mask:
            # Only the last tile can contain out-of-bounds rows / padded lanes;
            # redo its partial sum with a tile-relative validity mask.
            @pl.when(pl.program_id(0) == pl.num_programs(0) - 1)
            def _():
                row = lax.broadcasted_iota(jnp.int32, (tm, _LANE), 0)
                lane = lax.broadcasted_iota(jnp.int32, (tm, _LANE), 1)
                valid = (row * _LANE + lane) < tail_valid
                partial_ref[...] = jnp.sum(
                    jnp.where(valid, lm, 0.0), axis=0, keepdims=True)[None]

    return kernel


def bce_loss(logits_list, targets, *, tile_rows=2048):
    """Pallas equivalent of BCELoss.forward (sample_weight=None, size_sum=True).

    Args:
      logits_list: list/tuple whose first element is the [N, C] logits array.
      targets:     [N, C] targets in {0, 1} (or soft labels).
      tile_rows:   rows (of 128 lanes each) per pipelined tile; multiple of 8.
                   At the default 2048 the double-buffered working set is
                   ~6-7 MiB; if you raise it past ~4096 on v5e set
                   vmem_limit_bytes explicitly (16 MiB default scoped VMEM).

    Returns:
      ([loss], [loss_m]) with loss a scalar f32 and loss_m an [N, C] array in
      the logits dtype.
    """
    logits = logits_list[0]
    n, c = logits.shape
    total = n * c
    loss_m_dtype = logits.dtype

    rows = int(pl.cdiv(total, _LANE))
    pad = rows * _LANE - total

    x_flat = logits.reshape(-1)
    t_flat = targets.reshape(-1)
    if pad:
        # Ragged total: complete the last 128-lane row with (x=0, t=0).
        # This is the only case that materializes extra copies; totals that
        # are a multiple of 128 take the zero-copy path (free reshapes).
        x_flat = jnp.pad(x_flat, (0, pad))
        t_flat = jnp.pad(t_flat, (0, pad))
    x2d = x_flat.reshape(rows, _LANE)
    t2d = t_flat.reshape(rows, _LANE)

    tm = min(_round_up(tile_rows, _SUBLANE), _round_up(rows, _SUBLANE))
    num_tiles = int(pl.cdiv(rows, tm))
    # Valid elements inside the last tile (tile-relative; fits int32).
    tail_valid = total - (num_tiles - 1) * tm * _LANE
    needs_mask = tail_valid < tm * _LANE

    loss_m_2d, partials = pl.pallas_call(
        _make_bce_kernel(tm, tail_valid, needs_mask),
        out_shape=(
            jax.ShapeDtypeStruct((rows, _LANE), loss_m_dtype),
            jax.ShapeDtypeStruct((num_tiles, 1, _LANE), jnp.float32),
        ),
        grid_spec=pl.GridSpec(
            grid=(num_tiles,),
            in_specs=[
                pl.BlockSpec((tm, _LANE), lambda i: (i, 0)),
                pl.BlockSpec((tm, _LANE), lambda i: (i, 0)),
            ],
            out_specs=(
                pl.BlockSpec((tm, _LANE), lambda i: (i, 0)),
                pl.BlockSpec((1, 1, _LANE), lambda i: (i, 0, 0)),
            ),
        ),
        compiler_params=pltpu.CompilerParams(
            dimension_semantics=("parallel",)),
    )(x2d, t2d)

    if pad:
        loss_m = loss_m_2d.reshape(-1)[:total].reshape(n, c)
    else:
        loss_m = loss_m_2d.reshape(n, c)

    # size_sum=True: sum over classes, mean over batch == total_sum / N.
    loss = jnp.sum(partials) / jnp.float32(n)
    return ([loss], [loss_m])


def _reference(logits, targets):
    x = logits.astype(jnp.float32)
    t = targets.astype(jnp.float32)
    lm = jnp.maximum(x, 0.0) - x * t + jnp.log1p(jnp.exp(-jnp.abs(x)))
    return jnp.mean(jnp.sum(lm, axis=1)), lm


def _check(key, n, c, tile_rows):
    k1, k2 = jax.random.split(key)
    logits = jax.random.normal(k1, (n, c), dtype=jnp.float32) * 2.0
    targets = (jax.random.uniform(k2, (n, c)) > 0.5).astype(jnp.float32)

    loss_list, loss_m_list = bce_loss([logits], targets, tile_rows=tile_rows)
    loss = jax.block_until_ready(loss_list[0])
    loss_m = jax.block_until_ready(loss_m_list[0])

    ref_loss, ref_loss_m = _reference(logits, targets)
    assert loss_m.shape == (n, c)
    assert jnp.allclose(loss, ref_loss, atol=1e-5, rtol=1e-5)
    assert jnp.allclose(loss_m, ref_loss_m.astype(loss_m.dtype), atol=1e-5,
                        rtol=1e-5)


if __name__ == "__main__":
    key = jax.random.PRNGKey(0)
    k_a, k_b, k_c = jax.random.split(key, 3)

    # Primary small example: batch of 8, 32 attribute classes. total=256 is a
    # multiple of 128 -> zero-copy wrapper path, single (partial) tile.
    _check(k_a, n=8, c=32, tile_rows=2048)

    # Multi-tile check with a partial last grid block (rows=24, tm=16):
    # exercises the pl.when-gated last-tile masking and the parallel grid.
    _check(k_b, n=32, c=96, tile_rows=16)

    # Ragged total (250 elements): exercises the minimal last-row pad path.
    _check(k_c, n=5, c=50, tile_rows=8)

    print("KERNEL_OK")
</pallas_src>

<mosaic_0001>
module attributes {stable_mosaic.version = 11 : i64} {
  func.func @kernel(%arg0: i32, %arg1: memref<8x128xf32, #tpu.memory_space<vmem>>, %arg2: memref<8x128xf32, #tpu.memory_space<vmem>>, %arg3: memref<8x128xf32, #tpu.memory_space<vmem>>, %arg4: memref<1x1x128xf32, #tpu.memory_space<vmem>>) attributes {dimension_semantics = [#tpu.dimension_semantics<parallel>], iteration_bounds = array<i64: 1>, scalar_prefetch = 0 : i64, scratch_operands = 0 : i64, tpu.core_type = #tpu.core_type<tc>, window_params = [{transform_indices = @transform_0, window_bounds = array<i64: 8, 128>}, {transform_indices = @transform_1, window_bounds = array<i64: 8, 128>}, {transform_indices = @transform_2, window_bounds = array<i64: 8, 128>}, {transform_indices = @transform_3, window_bounds = array<i64: 1, 1, 128>}]} {
    %c0 = arith.constant 0 : index
    %c0_0 = arith.constant 0 : index
    %0 = vector.load %arg1[%c0, %c0_0] : memref<8x128xf32, #tpu.memory_space<vmem>>, vector<8x128xf32>
    %c0_1 = arith.constant 0 : index
    %c0_2 = arith.constant 0 : index
    %1 = vector.load %arg2[%c0_1, %c0_2] : memref<8x128xf32, #tpu.memory_space<vmem>>, vector<8x128xf32>
    %cst = arith.constant 0.000000e+00 : f32
    %2 = vector.broadcast %cst : f32 to vector<8x128xf32>
    %3 = arith.maximumf %0, %2 : vector<8x128xf32>
    %4 = arith.mulf %0, %1 : vector<8x128xf32>
    %5 = arith.subf %3, %4 : vector<8x128xf32>
    %6 = math.absf %0 : vector<8x128xf32>
    %cst_3 = arith.constant 0.000000e+00 : f32
    %7 = vector.broadcast %cst_3 : f32 to vector<8x128xf32>
    %8 = arith.subf %7, %6 : vector<8x128xf32>
    %9 = math.exp %8 : vector<8x128xf32>
    %10 = math.log1p %9 : vector<8x128xf32>
    %11 = arith.addf %5, %10 : vector<8x128xf32>
    %c0_4 = arith.constant 0 : index
    %c0_5 = arith.constant 0 : index
    %12 = vector.load %arg3[%c0_4, %c0_5] : memref<8x128xf32, #tpu.memory_space<vmem>>, vector<8x128xf32>
    tpu.vector_store %arg3[%c0_4, %c0_5], %11 {strides = array<i32>} : memref<8x128xf32, #tpu.memory_space<vmem>>, vector<8x128xf32>,
    %cst_6 = arith.constant dense<0.000000e+00> : vector<128xf32>
    %13 = vector.multi_reduction <add>, %11, %cst_6 [0] : vector<8x128xf32> to vector<128xf32>
    %14 = vector.shape_cast %13 : vector<128xf32> to vector<1x128xf32>
    %15 = vector.shape_cast %14 : vector<1x128xf32> to vector<1x1x128xf32>
    %c0_7 = arith.constant 0 : index
    %c0_8 = arith.constant 0 : index
    %c0_9 = arith.constant 0 : index
    %16 = vector.load %arg4[%c0_7, %c0_8, %c0_9] : memref<1x1x128xf32, #tpu.memory_space<vmem>>, vector<1x1x128xf32>
    tpu.vector_store %arg4[%c0_7, %c0_8, %c0_9], %15 {strides = array<i32>} : memref<1x1x128xf32, #tpu.memory_space<vmem>>, vector<1x1x128xf32>,
    %c0_i32 = arith.constant 0 : i32
    %17 = arith.cmpi eq, %arg0, %c0_i32 : i32
    %18 = arith.extui %17 : i1 to i32
    %c0_i32_10 = arith.constant 0 : i32
    %19 = arith.cmpi ne, %18, %c0_i32_10 : i32
    scf.if %19 {
      %20 = tpu.iota {dimensions = array<i32: 0>} : vector<8x128xi32>
      %21 = tpu.iota {dimensions = array<i32: 1>} : vector<8x128xi32>
      %c128_i32 = arith.constant 128 : i32
      %22 = vector.broadcast %c128_i32 : i32 to vector<8x128xi32>
      %23 = arith.muli %20, %22 : vector<8x128xi32>
      %24 = arith.addi %23, %21 : vector<8x128xi32>
      %c256_i32 = arith.constant 256 : i32
      %25 = vector.broadcast %c256_i32 : i32 to vector<8x128xi32>
      %26 = arith.cmpi slt, %24, %25 : vector<8x128xi32>
      %cst_11 = arith.constant 0.000000e+00 : f32
      %27 = vector.broadcast %cst_11 : f32 to vector<8x128xf32>
      %28 = arith.select %26, %11, %27 : vector<8x128xi1>, vector<8x128xf32>
      %cst_12 = arith.constant dense<0.000000e+00> : vector<128xf32>
      %29 = vector.multi_reduction <add>, %28, %cst_12 [0] : vector<8x128xf32> to vector<128xf32>
      %30 = vector.shape_cast %29 : vector<128xf32> to vector<1x128xf32>
      %31 = vector.shape_cast %30 : vector<1x128xf32> to vector<1x1x128xf32>
      %c0_13 = arith.constant 0 : index
      %c0_14 = arith.constant 0 : index
      %c0_15 = arith.constant 0 : index
      %32 = vector.load %arg4[%c0_13, %c0_14, %c0_15] : memref<1x1x128xf32, #tpu.memory_space<vmem>>, vector<1x1x128xf32>
      tpu.vector_store %arg4[%c0_13, %c0_14, %c0_15], %31 {strides = array<i32>} : memref<1x1x128xf32, #tpu.memory_space<vmem>>, vector<1x1x128xf32>,
    } else {
    }
    return
  }
  func.func @transform_0(%arg0: i32) -> (i32, i32) {
    %c0_i32 = arith.constant 0 : i32
    %c0_i32_0 = arith.constant 0 : i32
    return %arg0, %c0_i32 : i32, i32
  }
  func.func @transform_1(%arg0: i32) -> (i32, i32) {
    %c0_i32 = arith.constant 0 : i32
    %c0_i32_0 = arith.constant 0 : i32
    return %arg0, %c0_i32 : i32, i32
  }
  func.func @transform_2(%arg0: i32) -> (i32, i32) {
    %c0_i32 = arith.constant 0 : i32
    %c0_i32_0 = arith.constant 0 : i32
    return %arg0, %c0_i32 : i32, i32
  }
  func.func @transform_3(%arg0: i32) -> (i32, i32, i32) {
    %c0_i32 = arith.constant 0 : i32
    %c0_i32_0 = arith.constant 0 : i32
    %c0_i32_1 = arith.constant 0 : i32
    return %arg0, %c0_i32, %c0_i32_0 : i32, i32, i32
  }
}

</mosaic_0001>

<bundles_post_ra>
// kernel: tpu_custom_call.1
= control target key start
LH: loop header
LB: loop body
LE: loop exit
PB: predicated region body
PF: predicated region fallthrough
CT: control target
= control target key end

     0   :  { %9 = vsyncpa [#allocation3], 0  ;;  %s290_s0 = inlined_call_operand.hbm [shape: f32[2,128], index: 0, kind: input, shape index: {}]   ;;  %s291_s1 = inlined_call_operand.hbm [shape: f32[2,128], index: 1, kind: input, shape index: {}]   ;;  %s292_s2 = inlined_call_operand.hbm [shape: f32[2,128], index: 2, kind: output, shape index: {0}]   ;;  %s293_s3 = inlined_call_operand.hbm [shape: f32[1,1,128], index: 3, kind: output, shape index: {1}]  }
   0x1   :  { %10 = vsyncpa [#allocation6], 0 }
   0x2   :  { %11 = vsyncpa [#allocation4], 0 }
   0x3   :  { %12 = vsyncpa [#allocation9], 0 }
   0x4   :  { %16 = vsyncadd [#allocation3], 96  ;;  %s17_s14 = sshll.u32 %s290_s0, 4  ;;  %s243_s15 = smov [#allocation2]   ;;  %s18_s14 = int_to_ptr.hbm [resolvable:$true] %s17_s14 }
   0x5   :  { %s19_s16 = sshll.u32 %s243_s15, 4  ;;  %s244_s17 = smov 32   ;;  %s20_s16 = int_to_ptr.vmem [resolvable:$true] %s19_s16 }
   0x6   :  { %s245_s18 = smov 2  }
   0x7   :  { %25 = dma.hbm_to_vmem [thread:$0]  %s18_s14, 32, %s20_s16, [#allocation3], %s244_s17, %s244_s17, %s245_s18  }
   0x8   :  { %29 = vsyncadd [#allocation6], 96  ;;  %s30_s21 = sshll.u32 %s291_s1, 4  ;;  %s246_s22 = smov [#allocation5]   ;;  %s31_s21 = int_to_ptr.hbm [resolvable:$true] %s30_s21 }
   0x9   :  { %s32_s23 = sshll.u32 %s246_s22, 4  ;;  %s33_s23 = int_to_ptr.vmem [resolvable:$true] %s32_s23 }
   0xa   :  { %38 = dma.hbm_to_vmem [thread:$0]  %s31_s21, 32, %s33_s23, [#allocation6], %s244_s17, %s244_s17, %s245_s18  }
   0xb   :  { %235 = dma.done.wait [#allocation3], 128  }
   0xc   :  { %236 = vsyncadd [#allocation3], 4294967168 }
   0xd   :  { %237 = dma.done.wait [#allocation6], 128  }
   0xe   :  { %238 = vsyncadd [#allocation6], 4294967168  ;;  %v47_v0 = vld [vmem:[#allocation2] sm:$0xff]  ;;  %v78_v4 = vlaneseq  ;;  %v48_v9 = vld [vmem:[#allocation5] sm:$0xff] }
   0xf   :  { %v52_v1 = vand.u32 2147483647, %v47_v0  ;;  %v49_v13 = vmax.f32 %v47_v0, 0.0  ;;  %v50_v14 = vmul.f32 %v48_v9, %v47_v0 }
  0x10   :  { %v79_v6 = vshrl.u32 %v78_v4, 7  ;;  %v81_v11 = vand.u32 127, %v78_v4 }
  0x11   :  { %v53_v2 = vsub.f32 0.0, %v52_v1  ;;  %v51_v19 = vsub.f32 %v49_v13, %v50_v14 }
  0x12   :  { %v82_v12 = vmul.u32 128, %v79_v6 }
  0x13   :  { %v54_v3 = vmul.f32 1.442695, %v53_v2 }
  0x14   :  { %v83_v17 = vadd.s32 %v82_v12, %v81_v11 }
  0x15   :  { %135 = vpow2.f32 %v54_v3 }
  0x16   :  { %vm84_vm1 = vcmp.lt.s32.totalorder %v83_v17, 256 }
  0x1b   :  { %v136_v5 = vpop.eup %135 }
  0x1c   :  { %v56_v7 = vadd.f32 1.0, %v136_v5  ;;  %v59_v8 = vmul.f32 -0.5, %v136_v5  ;;  %v62_v15 = vand.u32 2147483647, %v136_v5 }
  0x1e   :  { %137 = vlog2.f32 %v56_v7  ;;  %v60_v10 = vadd.f32 1.0, %v59_v8  ;;  %vm63_vm0 = vcmp.lt.f32.partialorder %v62_v15, 0.0004427343 }
  0x20   :  { %v61_v16 = vmul.f32 %v136_v5, %v60_v10 }
  0x24   :  { %v138_v18 = vpop.eup %137 }
  0x25   :  { %v58_v20 = vmul.f32 0.6931472, %v138_v18 }
  0x27   :  { %v64_v21 = vsel %vm63_vm0, %v61_v16, %v58_v20 }
  0x28   :  { %v65_v22 = vadd.f32 %v64_v21, %v51_v19 }
  0x2a   :  { %v67_v23 = vrot.slane %v65_v22, 4  ;;  %66 = vst [vmem:[#allocation7] sm:$0xff] %v65_v22  ;;  %v85_v24 = vsel %vm84_vm1, %v65_v22, 0.0 }
  0x2b   :  { %v86_v25 = vrot.slane %v85_v24, 4 }
  0x2c   :  { %v68_v26 = vadd.f32 %v67_v23, %v65_v22 }
  0x2d   :  { %v87_v27 = vadd.f32 %v86_v25, %v85_v24 }
  0x2e   :  { %v69_v28 = vrot.slane %v68_v26, 2 }
  0x2f   :  { %v88_v29 = vrot.slane %v87_v27, 2 }
  0x30   :  { %v70_v30 = vadd.f32 %v69_v28, %v68_v26 }
  0x31   :  { %v89_v31 = vadd.f32 %v88_v29, %v87_v27 }
  0x32   :  { %v71_v32 = vrot.slane %v70_v30, 1 }
  0x33   :  { %v90_v33 = vrot.slane %v89_v31, 1 }
  0x34   :  { %v72_v34 = vadd.f32 %v71_v32, %v70_v30 }
  0x35   :  { %v91_v35 = vadd.f32 %v90_v33, %v89_v31 }
  0x36   :  { %73 = vst [vmem:[#allocation8] sm:$0x1] %v72_v34 }
  0x37   :  { %92 = vst [vmem:[#allocation8] sm:$0x1] %v91_v35 }
  0x38   :  { %96 = vsyncadd [#allocation4], 96  ;;  %s99_s24 = sshll.u32 %s292_s2, 4  ;;  %s247_s25 = smov [#allocation7]   ;;  %s100_s24 = int_to_ptr.hbm [resolvable:$true] %s99_s24 }
  0x39   :  { %s97_s26 = sshll.u32 %s247_s25, 4  ;;  %s248_s27 = smov [#allocation8]   ;;  %s98_s26 = int_to_ptr.vmem [resolvable:$true] %s97_s26 }
  0x3a   :  { %105 = dma.vmem_to_hbm [thread:$0]  %s98_s26, 32, %s100_s24, [#allocation4], %s244_s17, %s244_s17, %s245_s18  }
  0x3b   :  { %s111_s28 = sshll.u32 %s248_s27, 4  ;;  %s113_s4 = sshll.u32 %s293_s3, 4  ;;  %s112_s28 = int_to_ptr.vmem [resolvable:$true] %s111_s28  ;;  %s114_s4 = int_to_ptr.hbm [resolvable:$true] %s113_s4 }
  0x3c   :  { %116 = dma.vmem_to_hbm [thread:$0]  %s112_s28, 16, %s114_s4, [#allocation9]  }
  0x3d   :  { %239 = dma.done.wait [#allocation4], 128  }
  0x3e   :  { %240 = vsyncadd [#allocation4], 4294967168 }
  0x3f   :  { %241 = dma.done.wait [#allocation9], 16  }
  0x40   :  { %242 = vsyncadd [#allocation9], 4294967280 }
  0x41   :  { %125 = vsyncpa [#allocation3], 1 }
  0x42   :  { %126 = vsyncpa [#allocation6], 1 }
  0x43   :  { %127 = vsyncpa [#allocation4], 1 }
  0x44   :  { %128 = vsyncpa [#allocation9], 1 }

</bundles_post_ra>
